<compile_context>
chip_gen: v6e
topology: v6e:2x2x1
jax: 0.10.0
libtpu: 0.0.40
codegen_flags: <defaults>
</compile_context>

<pallas_src>
import functools

import jax
import jax.numpy as jnp
from jax.experimental import pallas as pl
from jax.experimental.pallas import tpu as pltpu


LANES = 128  # slab lane width = one full vreg lane span


# ---------------------------------------------------------------------------
# Weight packing: ONE padded f32 slab + static (Python) layout metadata
# ---------------------------------------------------------------------------
def _pack_params(params):
    """Packs every weight/bias into a single (rows, 128) f32 slab (one DMA
    instead of ~22) and returns static per-block metadata.

    Per TemporalBlock, conv1's two taps and (for non-identity blocks) the 1x1
    downsample conv are fused into ONE packed weight  [W1a | W1b | Wd]
    (Cin, 3*Cout); conv2 is packed as [W2a | W2b] (Cout, 2*Cout).  The two
    heads merge into a single (C, 3) weight (cols 0:2 = classification,
    col 2 = regression)."""
    pieces = []   # (row_offset, array)
    row = 0

    def add(arr):
        nonlocal row
        r0 = row
        nr, nc = arr.shape
        assert nc <= LANES
        row = r0 + ((nr + 7) // 8) * 8            # 8-sublane aligned starts
        pieces.append((r0, arr))
        return (r0, nr, nc)

    def add_block(p, dilation):
        cout = p["w1b"].shape[1]
        identity = "wd" not in p
        w1_parts = [p["w1a"], p["w1b"]] + ([] if identity else [p["wd"]])
        return dict(
            dilation=dilation, cout=cout, identity=identity,
            w1=add(jnp.concatenate(w1_parts, axis=1)),      # (Cin, 2C or 3C)
            b1=add(p["b1"]),
            w2=add(jnp.concatenate([p["w2a"], p["w2b"]], axis=1)),  # (C, 2C)
            b2=add(p["b2"]),
            bd=None if identity else add(p["bd"]),
        )

    ctx_cfg = [add_block(p, 2 ** i) for i, p in enumerate(params["ctx_blocks"])]
    common_cfg = [add_block(p, 2 ** i) for i, p in enumerate(params["common_blocks"])]
    h = params["heads"]
    head_cfg = dict(
        w=add(jnp.concatenate([h["w_cl"], h["w_reg"]], axis=1)),   # (C, 3)
        b=add(jnp.concatenate([h["b_cl"], h["b_reg"]], axis=1)),   # (1, 3)
    )

    slab = jnp.zeros((max(row, 8), LANES), jnp.float32)
    for r0, arr in pieces:
        nr, nc = arr.shape
        slab = slab.at[r0:r0 + nr, :nc].set(arr.astype(jnp.float32))
    return slab, ctx_cfg, common_cfg, head_cfg


# ---------------------------------------------------------------------------
# Fused kernel
# ---------------------------------------------------------------------------
def _make_fused_kernel(ctx_cfg, common_cfg, head_cfg, *, seg_len, mxu_dtype):
    """Activations are channels-last and time-flattened: (nb*seg_len, C)."""
    dilations = sorted({c["dilation"] for c in ctx_cfg + common_cfg})

    def kernel(x_ctx_ref, x_in_ref, w_ref, out_ref):
        x_ctx = x_ctx_ref[...]    # (R, C_ctx_in)
        x_in = x_in_ref[...]      # (R, C_raw_in), zero-padded for rows >= L per segment
        R = x_ctx.shape[0]

        # Hoisted causal-shift masks: iota/mod/compare emitted ONCE (JAX does
        # not CSE broadcast_in_dim) instead of once per conv.
        t = jax.lax.broadcasted_iota(jnp.int32, (R, 1), 0) % seg_len
        masks = {d: t < d for d in dilations}

        def load(entry):                      # static slice of the weight slab
            r0, nr, nc = entry
            return w_ref[r0:r0 + nr, 0:nc]

        def mm(a, w):
            # bf16 operands = MXU fast path on v5e/v6e/v7x; f32 accumulate.
            # All element-wise math (shift/mask/bias/ReLU/residual) stays f32.
            return jnp.dot(a.astype(mxu_dtype), w.astype(mxu_dtype),
                           preferred_element_type=jnp.float32)

        def causal_shift(v, d):
            # out[t] = v[t-d] within each seg_len segment, 0 for t < d.
            # roll wraps across segments, but exactly those rows are masked.
            return jnp.where(masks[d], 0.0, pltpu.roll(v, shift=d, axis=0))

        def temporal_block(x, cfg):
            d, cout = cfg["dilation"], cfg["cout"]
            # conv1 (+ folded 1x1 downsample): ONE packed matmul
            p1 = mm(x, load(cfg["w1"]))                    # (R, 2C [+ C])
            h1 = jnp.maximum(
                causal_shift(p1[:, :cout], d) + p1[:, cout:2 * cout] + load(cfg["b1"]),
                0.0)                                       # ReLU (dropout = identity)
            # conv2: one packed matmul
            p2 = mm(h1, load(cfg["w2"]))                   # (R, 2C)
            h2 = jnp.maximum(
                causal_shift(p2[:, :cout], d) + p2[:, cout:2 * cout] + load(cfg["b2"]),
                0.0)
            if cfg["identity"]:                            # Cin == Cout
                res = x
            else:                                          # folded 1x1 downsample
                res = p1[:, 2 * cout:3 * cout] + load(cfg["bd"])
            return jnp.maximum(h2 + res, 0.0)

        # Context TCN (its chomp is implicit: everything downstream is causal
        # and only row L-1 of each segment is read by the heads).
        y = x_ctx
        for cfg in ctx_cfg:
            y = temporal_block(y, cfg)

        # Common TCN on the lane-concat of (ctx features, raw input): one
        # cheap 12-lane concat instead of the row-split two-matmul form.
        y = jnp.concatenate([y, x_in], axis=-1)
        for cfg in common_cfg:
            y = temporal_block(y, cfg)

        # Heads: single (R, C) @ (C, 3) matmul over ALL rows (same MXU pass
        # cost); the per-batch last-timestep gather happens in the wrapper.
        out_ref[...] = mm(y, load(head_cfg["w"])) + load(head_cfg["b"])

    return kernel


# ---------------------------------------------------------------------------
# Wrapper
# ---------------------------------------------------------------------------
def _device_info():
    try:
        d = jax.devices()[0]
        return d.platform, d.device_kind.lower()
    except Exception:
        return "", ""


def _default_use_bf16():
    plat, _ = _device_info()
    return plat == "tpu"


def _default_batch_parallel(B):
    # Chunk across cores only on dual-TC v7x AND only when the batch is large
    # enough that duplicating the weight DMA + grid overhead per core pays off.
    _, kind = _device_info()
    return ("v7" in kind) and B > 8


@functools.partial(jax.jit,
                   static_argnames=("output_len", "batch_parallel", "use_bf16_mxu"))
def basic_task_net(params, input_ctx_ncl, input_ncl, output_len,
                   batch_parallel=None, use_bf16_mxu=None):
    """Mirrors BasicTaskNet.forward (inference).  Inputs in PyTorch NCL layout.
    Returns (y_cl (B, 2), y_reg (B, 1))."""
    # NCL -> channels-last: time -> sublanes, channels -> lanes
    x_ctx = jnp.transpose(input_ctx_ncl, (0, 2, 1)).astype(jnp.float32)  # (B, Lc, Cctx)
    x_in = jnp.transpose(input_ncl, (0, 2, 1)).astype(jnp.float32)       # (B, L, Craw)
    B, Lc, Cctx = x_ctx.shape
    _, L, Craw = x_in.shape
    assert L == Lc - output_len

    if use_bf16_mxu is None:
        use_bf16_mxu = _default_use_bf16()
    if batch_parallel is None:
        batch_parallel = _default_batch_parallel(B)
    mxu_dtype = jnp.bfloat16 if use_bf16_mxu else jnp.float32

    # Zero-pad the raw input along time to the ctx length so both inputs share
    # one uniform segment length (causality: padded tail never reaches row L-1).
    x_in = jnp.pad(x_in, ((0, 0), (0, output_len), (0, 0)))
    x_ctx_f = x_ctx.reshape(B * Lc, Cctx)
    x_in_f = x_in.reshape(B * Lc, Craw)

    slab, ctx_cfg, common_cfg, head_cfg = _pack_params(params)
    kernel = _make_fused_kernel(ctx_cfg, common_cfg, head_cfg,
                                seg_len=Lc, mxu_dtype=mxu_dtype)

    n_chunks = 2
    chunk_rows = (B // n_chunks) * Lc if B % n_chunks == 0 else 0
    if batch_parallel and chunk_rows > 0 and chunk_rows % 8 == 0:
        # Two grid steps, one flattened batch chunk per TensorCore (v7x).
        out_full = pl.pallas_call(
            kernel,
            out_shape=jax.ShapeDtypeStruct((B * Lc, 3), jnp.float32),
            grid=(n_chunks,),
            in_specs=[
                pl.BlockSpec((chunk_rows, Cctx), lambda c: (c, 0)),
                pl.BlockSpec((chunk_rows, Craw), lambda c: (c, 0)),
                pl.BlockSpec(slab.shape, lambda c: (0, 0)),
            ],
            out_specs=pl.BlockSpec((chunk_rows, 3), lambda c: (c, 0)),
            compiler_params=pltpu.CompilerParams(
                dimension_semantics=("parallel",)),
        )(x_ctx_f, x_in_f, slab)
    else:
        # Single invocation: batch flattened into sublane rows; 3 input DMAs;
        # every intermediate (<150 KiB total) stays resident in VMEM.
        out_full = pl.pallas_call(
            kernel,
            out_shape=jax.ShapeDtypeStruct((B * Lc, 3), jnp.float32),
        )(x_ctx_f, x_in_f, slab)

    # Gather the per-batch last valid timestep OUTSIDE the kernel
    # (matmul-first, gather-later).
    rows = (L - 1) + Lc * jnp.arange(B)
    y_last = out_full[rows]                      # (B, 3)
    return y_last[:, :2], y_last[:, 2:3]         # (classification, regression)


# ---------------------------------------------------------------------------
# Deterministic parameter init (effective weights; weight_norm folded in)
# ---------------------------------------------------------------------------
def init_block(key, cin, cout, scale=0.1):
    ks = jax.random.split(key, 8)
    p = {
        "w1a": scale * jax.random.normal(ks[0], (cin, cout), jnp.float32),
        "w1b": scale * jax.random.normal(ks[1], (cin, cout), jnp.float32),
        "b1": scale * jax.random.normal(ks[2], (1, cout), jnp.float32),
        "w2a": scale * jax.random.normal(ks[3], (cout, cout), jnp.float32),
        "w2b": scale * jax.random.normal(ks[4], (cout, cout), jnp.float32),
        "b2": scale * jax.random.normal(ks[5], (1, cout), jnp.float32),
    }
    if cin != cout:  # 1x1 downsample conv; identity residual otherwise
        p["wd"] = scale * jax.random.normal(ks[6], (cin, cout), jnp.float32)
        p["bd"] = scale * jax.random.normal(ks[7], (1, cout), jnp.float32)
    return p


def init_tcn(key, num_inputs, num_channels):
    blocks = []
    keys = jax.random.split(key, len(num_channels))
    for i, cout in enumerate(num_channels):
        cin = num_inputs if i == 0 else num_channels[i - 1]
        blocks.append(init_block(keys[i], cin, cout))
    return blocks


def init_params(key, ctx_num_inputs, ctx_channels, common_num_inputs, common_channels):
    k1, k2, k3, k4, k5, k6 = jax.random.split(key, 6)
    c_last = common_channels[-1]
    return {
        "ctx_blocks": init_tcn(k1, ctx_num_inputs, ctx_channels),
        "common_blocks": init_tcn(k2, common_num_inputs, common_channels),
        "heads": {
            "w_reg": 0.1 * jax.random.normal(k3, (c_last, 1), jnp.float32),
            "b_reg": 0.1 * jax.random.normal(k4, (1, 1), jnp.float32),
            "w_cl": 0.1 * jax.random.normal(k5, (c_last, 2), jnp.float32),
            "b_cl": 0.1 * jax.random.normal(k6, (1, 2), jnp.float32),
        },
    }


# ---------------------------------------------------------------------------
# Pure-JAX reference (same math, no Pallas) for correctness checks
# ---------------------------------------------------------------------------
def _shift_ref(x, d):  # x: (B, L, C)
    return jnp.concatenate([jnp.zeros_like(x[:, :d, :]), x[:, : x.shape[1] - d, :]], axis=1)


def _block_ref(x, p, d):
    h1 = jnp.maximum(_shift_ref(x, d) @ p["w1a"] + x @ p["w1b"] + p["b1"], 0.0)
    h2 = jnp.maximum(_shift_ref(h1, d) @ p["w2a"] + h1 @ p["w2b"] + p["b2"], 0.0)
    res = (x @ p["wd"] + p["bd"]) if "wd" in p else x
    return jnp.maximum(h2 + res, 0.0)


def _tcn_ref(x, blocks):
    for i, p in enumerate(blocks):
        x = _block_ref(x, p, 2 ** i)
    return x


def basic_task_net_ref(params, input_ctx_ncl, input_ncl, output_len):
    x_ctx = jnp.transpose(input_ctx_ncl, (0, 2, 1)).astype(jnp.float32)
    x_in = jnp.transpose(input_ncl, (0, 2, 1)).astype(jnp.float32)
    y1 = _tcn_ref(x_ctx, params["ctx_blocks"])[:, : x_ctx.shape[1] - output_len, :]
    yc = jnp.concatenate([y1, x_in], axis=-1)
    y2 = _tcn_ref(yc, params["common_blocks"])
    y_last = y2[:, -1, :]
    h = params["heads"]
    return y_last @ h["w_cl"] + h["b_cl"], y_last @ h["w_reg"] + h["b_reg"]


# ---------------------------------------------------------------------------
if __name__ == "__main__":
    # Config consistent with the module:
    #   ctx_net_opt = dict(output_len=4, num_channels=[8, 8]); ContextNet num_inputs=5
    #   common_net: num_inputs = 8 (ctx out channels) + 4 (raw input channels) = 12
    B = 2
    CTX_C_IN, CTX_CHANNELS = 5, [8, 8]
    OUTPUT_LEN = 4
    L_CTX = 16
    L = L_CTX - OUTPUT_LEN              # 12
    IN_C = 4
    COMMON_C_IN = CTX_CHANNELS[-1] + IN_C   # 12
    COMMON_CHANNELS = [16, 16]

    key = jax.random.PRNGKey(0)
    k_params, k_ctx, k_in = jax.random.split(key, 3)
    params = init_params(k_params, CTX_C_IN, CTX_CHANNELS, COMMON_C_IN, COMMON_CHANNELS)

    # Inputs in PyTorch NCL layout
    input_ctx = jax.random.normal(k_ctx, (B, CTX_C_IN, L_CTX), jnp.float32)
    input_x = jax.random.normal(k_in, (B, IN_C, L), jnp.float32)

    y_cl_ref, y_reg_ref = basic_task_net_ref(params, input_ctx, input_x, OUTPUT_LEN)

    # 1) f32 MXU operands, single flattened invocation: exact-ish vs reference.
    y_cl, y_reg = jax.block_until_ready(
        basic_task_net(params, input_ctx, input_x, output_len=OUTPUT_LEN,
                       batch_parallel=False, use_bf16_mxu=False))
    assert y_cl.shape == (B, 2) and y_reg.shape == (B, 1)
    assert jnp.allclose(y_cl, y_cl_ref, atol=1e-5, rtol=1e-5)
    assert jnp.allclose(y_reg, y_reg_ref, atol=1e-5, rtol=1e-5)

    # 2) f32 MXU, 2-chunk "parallel" grid path (v7x layout; valid on 1-TC chips too).
    y_cl2, y_reg2 = jax.block_until_ready(
        basic_task_net(params, input_ctx, input_x, output_len=OUTPUT_LEN,
                       batch_parallel=True, use_bf16_mxu=False))
    assert jnp.allclose(y_cl2, y_cl_ref, atol=1e-5, rtol=1e-5)
    assert jnp.allclose(y_reg2, y_reg_ref, atol=1e-5, rtol=1e-5)

    # 3) Device-default path (bf16 MXU operands on TPU, f32 accumulate +
    #    f32 element-wise math) -- looser tolerance for the reduced-precision MXU.
    y_cl3, y_reg3 = jax.block_until_ready(
        basic_task_net(params, input_ctx, input_x, output_len=OUTPUT_LEN))
    assert bool(jnp.all(jnp.isfinite(y_cl3))) and bool(jnp.all(jnp.isfinite(y_reg3)))
    assert jnp.allclose(y_cl3, y_cl_ref, atol=1e-1, rtol=1e-1)
    assert jnp.allclose(y_reg3, y_reg_ref, atol=1e-1, rtol=1e-1)

    print("KERNEL_OK")
</pallas_src>

<mosaic_0001>
module attributes {stable_mosaic.version = 11 : i64} {
  func.func @kernel(%arg0: memref<32x5xf32, #tpu.memory_space<vmem>>, %arg1: memref<32x4xf32, #tpu.memory_space<vmem>>, %arg2: memref<200x128xf32, #tpu.memory_space<vmem>>, %arg3: memref<32x3xf32, #tpu.memory_space<vmem>>) attributes {dimension_semantics = [], scalar_prefetch = 0 : i64, scratch_operands = 0 : i64, tpu.core_type = #tpu.core_type<tc>} {
    %c0 = arith.constant 0 : index
    %c0_0 = arith.constant 0 : index
    %0 = vector.load %arg0[%c0, %c0_0] : memref<32x5xf32, #tpu.memory_space<vmem>>, vector<32x5xf32>
    %c0_1 = arith.constant 0 : index
    %c0_2 = arith.constant 0 : index
    %1 = vector.load %arg1[%c0_1, %c0_2] : memref<32x4xf32, #tpu.memory_space<vmem>>, vector<32x4xf32>
    %2 = tpu.iota {dimensions = array<i32: 0>} : vector<32x1xi32>
    %c16_i32 = arith.constant 16 : i32
    %c0_i32 = arith.constant 0 : i32
    %3 = arith.cmpi eq, %c16_i32, %c0_i32 : i32
    %c1_i32 = arith.constant 1 : i32
    %4 = arith.select %3, %c1_i32, %c16_i32 : i32
    %5 = vector.broadcast %4 : i32 to vector<32x1xi32>
    %6 = arith.remsi %2, %5 : vector<32x1xi32>
    %c0_i32_3 = arith.constant 0 : i32
    %7 = vector.broadcast %c0_i32_3 : i32 to vector<32x1xi32>
    %8 = arith.cmpi ne, %6, %7 : vector<32x1xi32>
    %c0_i32_4 = arith.constant 0 : i32
    %9 = vector.broadcast %c0_i32_4 : i32 to vector<32x1xi32>
    %10 = arith.cmpi slt, %6, %9 : vector<32x1xi32>
    %c0_i32_5 = arith.constant 0 : i32
    %11 = arith.cmpi slt, %4, %c0_i32_5 : i32
    %12 = vector.broadcast %11 : i1 to vector<32x1xi1>
    %13 = vector.broadcast %12 : vector<32x1xi1> to vector<32x1xi1>
    %14 = arith.xori %10, %13 : vector<32x1xi1>
    %15 = arith.andi %14, %8 : vector<32x1xi1>
    %16 = vector.broadcast %4 : i32 to vector<32x1xi32>
    %17 = arith.addi %6, %16 : vector<32x1xi32>
    %18 = arith.select %15, %17, %6 : vector<32x1xi1>, vector<32x1xi32>
    %c1_i32_6 = arith.constant 1 : i32
    %19 = vector.broadcast %c1_i32_6 : i32 to vector<32x1xi32>
    %20 = arith.cmpi slt, %18, %19 : vector<32x1xi32>
    %c2_i32 = arith.constant 2 : i32
    %21 = vector.broadcast %c2_i32 : i32 to vector<32x1xi32>
    %22 = arith.cmpi slt, %18, %21 : vector<32x1xi32>
    %c0_7 = arith.constant 0 : index
    %c0_8 = arith.constant 0 : index
    %23 = vector.load %arg2[%c0_7, %c0_8] : memref<200x128xf32, #tpu.memory_space<vmem>>, vector<5x24xf32>
    %cst = arith.constant dense<0.000000e+00> : vector<32x24xf32>
    %24 = tpu.matmul %0, %23, %cst {dimension_numbers = #tpu.dot_dimension_numbers<[1], [0], [0], [1], [0, 0, 1, 1], [], []>} : vector<32x5xf32>, vector<5x24xf32>, vector<32x24xf32> -> vector<32x24xf32>
    %25 = vector.extract_strided_slice %24 {offsets = [0, 0], sizes = [32, 8], strides = [1, 1]} : vector<32x24xf32> to vector<32x8xf32>
    %c1_i32_9 = arith.constant 1 : i32
    %26 = tpu.dynamic_rotate %25 by %c1_i32_9 dim 0 : vector<32x8xf32>, i32 -> vector<32x8xf32>
    %cst_10 = arith.constant 0.000000e+00 : f32
    %27 = vector.shape_cast %20 : vector<32x1xi1> to vector<32x1xi1>
    %28 = vector.broadcast %27 : vector<32x1xi1> to vector<32x8xi1>
    %29 = vector.broadcast %cst_10 : f32 to vector<32x8xf32>
    %30 = arith.select %28, %29, %26 : vector<32x8xi1>, vector<32x8xf32>
    %31 = vector.extract_strided_slice %24 {offsets = [0, 8], sizes = [32, 8], strides = [1, 1]} : vector<32x24xf32> to vector<32x8xf32>
    %32 = arith.addf %30, %31 : vector<32x8xf32>
    %c8 = arith.constant 8 : index
    %c0_11 = arith.constant 0 : index
    %33 = vector.load %arg2[%c8, %c0_11] : memref<200x128xf32, #tpu.memory_space<vmem>>, vector<1x8xf32>
    %34 = vector.broadcast %33 : vector<1x8xf32> to vector<32x8xf32>
    %35 = arith.addf %32, %34 : vector<32x8xf32>
    %cst_12 = arith.constant 0.000000e+00 : f32
    %36 = vector.broadcast %cst_12 : f32 to vector<32x8xf32>
    %37 = arith.maximumf %35, %36 : vector<32x8xf32>
    %c16 = arith.constant 16 : index
    %c0_13 = arith.constant 0 : index
    %38 = vector.load %arg2[%c16, %c0_13] : memref<200x128xf32, #tpu.memory_space<vmem>>, vector<8x16xf32>
    %cst_14 = arith.constant dense<0.000000e+00> : vector<32x16xf32>
    %39 = tpu.matmul %37, %38, %cst_14 {dimension_numbers = #tpu.dot_dimension_numbers<[1], [0], [0], [1], [0, 0, 1, 1], [], []>} : vector<32x8xf32>, vector<8x16xf32>, vector<32x16xf32> -> vector<32x16xf32>
    %40 = vector.extract_strided_slice %39 {offsets = [0, 0], sizes = [32, 8], strides = [1, 1]} : vector<32x16xf32> to vector<32x8xf32>
    %c1_i32_15 = arith.constant 1 : i32
    %41 = tpu.dynamic_rotate %40 by %c1_i32_15 dim 0 : vector<32x8xf32>, i32 -> vector<32x8xf32>
    %cst_16 = arith.constant 0.000000e+00 : f32
    %42 = vector.shape_cast %20 : vector<32x1xi1> to vector<32x1xi1>
    %43 = vector.broadcast %42 : vector<32x1xi1> to vector<32x8xi1>
    %44 = vector.broadcast %cst_16 : f32 to vector<32x8xf32>
    %45 = arith.select %43, %44, %41 : vector<32x8xi1>, vector<32x8xf32>
    %46 = vector.extract_strided_slice %39 {offsets = [0, 8], sizes = [32, 8], strides = [1, 1]} : vector<32x16xf32> to vector<32x8xf32>
    %47 = arith.addf %45, %46 : vector<32x8xf32>
    %c24 = arith.constant 24 : index
    %c0_17 = arith.constant 0 : index
    %48 = vector.load %arg2[%c24, %c0_17] : memref<200x128xf32, #tpu.memory_space<vmem>>, vector<1x8xf32>
    %49 = vector.broadcast %48 : vector<1x8xf32> to vector<32x8xf32>
    %50 = arith.addf %47, %49 : vector<32x8xf32>
    %cst_18 = arith.constant 0.000000e+00 : f32
    %51 = vector.broadcast %cst_18 : f32 to vector<32x8xf32>
    %52 = arith.maximumf %50, %51 : vector<32x8xf32>
    %53 = vector.extract_strided_slice %24 {offsets = [0, 16], sizes = [32, 8], strides = [1, 1]} : vector<32x24xf32> to vector<32x8xf32>
    %c32 = arith.constant 32 : index
    %c0_19 = arith.constant 0 : index
    %54 = vector.load %arg2[%c32, %c0_19] : memref<200x128xf32, #tpu.memory_space<vmem>>, vector<1x8xf32>
    %55 = vector.broadcast %54 : vector<1x8xf32> to vector<32x8xf32>
    %56 = arith.addf %53, %55 : vector<32x8xf32>
    %57 = arith.addf %52, %56 : vector<32x8xf32>
    %cst_20 = arith.constant 0.000000e+00 : f32
    %58 = vector.broadcast %cst_20 : f32 to vector<32x8xf32>
    %59 = arith.maximumf %57, %58 : vector<32x8xf32>
    %c40 = arith.constant 40 : index
    %c0_21 = arith.constant 0 : index
    %60 = vector.load %arg2[%c40, %c0_21] : memref<200x128xf32, #tpu.memory_space<vmem>>, vector<8x16xf32>
    %cst_22 = arith.constant dense<0.000000e+00> : vector<32x16xf32>
    %61 = tpu.matmul %59, %60, %cst_22 {dimension_numbers = #tpu.dot_dimension_numbers<[1], [0], [0], [1], [0, 0, 1, 1], [], []>} : vector<32x8xf32>, vector<8x16xf32>, vector<32x16xf32> -> vector<32x16xf32>
    %62 = vector.extract_strided_slice %61 {offsets = [0, 0], sizes = [32, 8], strides = [1, 1]} : vector<32x16xf32> to vector<32x8xf32>
    %c2_i32_23 = arith.constant 2 : i32
    %63 = tpu.dynamic_rotate %62 by %c2_i32_23 dim 0 : vector<32x8xf32>, i32 -> vector<32x8xf32>
    %cst_24 = arith.constant 0.000000e+00 : f32
    %64 = vector.shape_cast %22 : vector<32x1xi1> to vector<32x1xi1>
    %65 = vector.broadcast %64 : vector<32x1xi1> to vector<32x8xi1>
    %66 = vector.broadcast %cst_24 : f32 to vector<32x8xf32>
    %67 = arith.select %65, %66, %63 : vector<32x8xi1>, vector<32x8xf32>
    %68 = vector.extract_strided_slice %61 {offsets = [0, 8], sizes = [32, 8], strides = [1, 1]} : vector<32x16xf32> to vector<32x8xf32>
    %69 = arith.addf %67, %68 : vector<32x8xf32>
    %c48 = arith.constant 48 : index
    %c0_25 = arith.constant 0 : index
    %70 = vector.load %arg2[%c48, %c0_25] : memref<200x128xf32, #tpu.memory_space<vmem>>, vector<1x8xf32>
    %71 = vector.broadcast %70 : vector<1x8xf32> to vector<32x8xf32>
    %72 = arith.addf %69, %71 : vector<32x8xf32>
    %cst_26 = arith.constant 0.000000e+00 : f32
    %73 = vector.broadcast %cst_26 : f32 to vector<32x8xf32>
    %74 = arith.maximumf %72, %73 : vector<32x8xf32>
    %c56 = arith.constant 56 : index
    %c0_27 = arith.constant 0 : index
    %75 = vector.load %arg2[%c56, %c0_27] : memref<200x128xf32, #tpu.memory_space<vmem>>, vector<8x16xf32>
    %cst_28 = arith.constant dense<0.000000e+00> : vector<32x16xf32>
    %76 = tpu.matmul %74, %75, %cst_28 {dimension_numbers = #tpu.dot_dimension_numbers<[1], [0], [0], [1], [0, 0, 1, 1], [], []>} : vector<32x8xf32>, vector<8x16xf32>, vector<32x16xf32> -> vector<32x16xf32>
    %77 = vector.extract_strided_slice %76 {offsets = [0, 0], sizes = [32, 8], strides = [1, 1]} : vector<32x16xf32> to vector<32x8xf32>
    %c2_i32_29 = arith.constant 2 : i32
    %78 = tpu.dynamic_rotate %77 by %c2_i32_29 dim 0 : vector<32x8xf32>, i32 -> vector<32x8xf32>
    %cst_30 = arith.constant 0.000000e+00 : f32
    %79 = vector.shape_cast %22 : vector<32x1xi1> to vector<32x1xi1>
    %80 = vector.broadcast %79 : vector<32x1xi1> to vector<32x8xi1>
    %81 = vector.broadcast %cst_30 : f32 to vector<32x8xf32>
    %82 = arith.select %80, %81, %78 : vector<32x8xi1>, vector<32x8xf32>
    %83 = vector.extract_strided_slice %76 {offsets = [0, 8], sizes = [32, 8], strides = [1, 1]} : vector<32x16xf32> to vector<32x8xf32>
    %84 = arith.addf %82, %83 : vector<32x8xf32>
    %c64 = arith.constant 64 : index
    %c0_31 = arith.constant 0 : index
    %85 = vector.load %arg2[%c64, %c0_31] : memref<200x128xf32, #tpu.memory_space<vmem>>, vector<1x8xf32>
    %86 = vector.broadcast %85 : vector<1x8xf32> to vector<32x8xf32>
    %87 = arith.addf %84, %86 : vector<32x8xf32>
    %cst_32 = arith.constant 0.000000e+00 : f32
    %88 = vector.broadcast %cst_32 : f32 to vector<32x8xf32>
    %89 = arith.maximumf %87, %88 : vector<32x8xf32>
    %90 = arith.addf %89, %59 : vector<32x8xf32>
    %cst_33 = arith.constant 0.000000e+00 : f32
    %91 = vector.broadcast %cst_33 : f32 to vector<32x8xf32>
    %92 = arith.maximumf %90, %91 : vector<32x8xf32>
    %93 = tpu.concatenate %92, %1 in 1 : vector<32x8xf32>, vector<32x4xf32> -> vector<32x12xf32>
    %c72 = arith.constant 72 : index
    %c0_34 = arith.constant 0 : index
    %94 = vector.load %arg2[%c72, %c0_34] : memref<200x128xf32, #tpu.memory_space<vmem>>, vector<12x48xf32>
    %cst_35 = arith.constant dense<0.000000e+00> : vector<32x48xf32>
    %95 = tpu.matmul %93, %94, %cst_35 {dimension_numbers = #tpu.dot_dimension_numbers<[1], [0], [0], [1], [0, 0, 1, 1], [], []>} : vector<32x12xf32>, vector<12x48xf32>, vector<32x48xf32> -> vector<32x48xf32>
    %96 = vector.extract_strided_slice %95 {offsets = [0, 0], sizes = [32, 16], strides = [1, 1]} : vector<32x48xf32> to vector<32x16xf32>
    %c1_i32_36 = arith.constant 1 : i32
    %97 = tpu.dynamic_rotate %96 by %c1_i32_36 dim 0 : vector<32x16xf32>, i32 -> vector<32x16xf32>
    %cst_37 = arith.constant 0.000000e+00 : f32
    %98 = vector.shape_cast %20 : vector<32x1xi1> to vector<32x1xi1>
    %99 = vector.broadcast %98 : vector<32x1xi1> to vector<32x16xi1>
    %100 = vector.broadcast %cst_37 : f32 to vector<32x16xf32>
    %101 = arith.select %99, %100, %97 : vector<32x16xi1>, vector<32x16xf32>
    %102 = vector.extract_strided_slice %95 {offsets = [0, 16], sizes = [32, 16], strides = [1, 1]} : vector<32x48xf32> to vector<32x16xf32>
    %103 = arith.addf %101, %102 : vector<32x16xf32>
    %c88 = arith.constant 88 : index
    %c0_38 = arith.constant 0 : index
    %104 = vector.load %arg2[%c88, %c0_38] : memref<200x128xf32, #tpu.memory_space<vmem>>, vector<1x16xf32>
    %105 = vector.broadcast %104 : vector<1x16xf32> to vector<32x16xf32>
    %106 = arith.addf %103, %105 : vector<32x16xf32>
    %cst_39 = arith.constant 0.000000e+00 : f32
    %107 = vector.broadcast %cst_39 : f32 to vector<32x16xf32>
    %108 = arith.maximumf %106, %107 : vector<32x16xf32>
    %c96 = arith.constant 96 : index
    %c0_40 = arith.constant 0 : index
    %109 = vector.load %arg2[%c96, %c0_40] : memref<200x128xf32, #tpu.memory_space<vmem>>, vector<16x32xf32>
    %cst_41 = arith.constant dense<0.000000e+00> : vector<32x32xf32>
    %110 = tpu.matmul %108, %109, %cst_41 {dimension_numbers = #tpu.dot_dimension_numbers<[1], [0], [0], [1], [0, 0, 1, 1], [], []>} : vector<32x16xf32>, vector<16x32xf32>, vector<32x32xf32> -> vector<32x32xf32>
    %111 = vector.extract_strided_slice %110 {offsets = [0, 0], sizes = [32, 16], strides = [1, 1]} : vector<32x32xf32> to vector<32x16xf32>
    %c1_i32_42 = arith.constant 1 : i32
    %112 = tpu.dynamic_rotate %111 by %c1_i32_42 dim 0 : vector<32x16xf32>, i32 -> vector<32x16xf32>
    %cst_43 = arith.constant 0.000000e+00 : f32
    %113 = vector.shape_cast %20 : vector<32x1xi1> to vector<32x1xi1>
    %114 = vector.broadcast %113 : vector<32x1xi1> to vector<32x16xi1>
    %115 = vector.broadcast %cst_43 : f32 to vector<32x16xf32>
    %116 = arith.select %114, %115, %112 : vector<32x16xi1>, vector<32x16xf32>
    %117 = vector.extract_strided_slice %110 {offsets = [0, 16], sizes = [32, 16], strides = [1, 1]} : vector<32x32xf32> to vector<32x16xf32>
    %118 = arith.addf %116, %117 : vector<32x16xf32>
    %c112 = arith.constant 112 : index
    %c0_44 = arith.constant 0 : index
    %119 = vector.load %arg2[%c112, %c0_44] : memref<200x128xf32, #tpu.memory_space<vmem>>, vector<1x16xf32>
    %120 = vector.broadcast %119 : vector<1x16xf32> to vector<32x16xf32>
    %121 = arith.addf %118, %120 : vector<32x16xf32>
    %cst_45 = arith.constant 0.000000e+00 : f32
    %122 = vector.broadcast %cst_45 : f32 to vector<32x16xf32>
    %123 = arith.maximumf %121, %122 : vector<32x16xf32>
    %124 = vector.extract_strided_slice %95 {offsets = [0, 32], sizes = [32, 16], strides = [1, 1]} : vector<32x48xf32> to vector<32x16xf32>
    %c120 = arith.constant 120 : index
    %c0_46 = arith.constant 0 : index
    %125 = vector.load %arg2[%c120, %c0_46] : memref<200x128xf32, #tpu.memory_space<vmem>>, vector<1x16xf32>
    %126 = vector.broadcast %125 : vector<1x16xf32> to vector<32x16xf32>
    %127 = arith.addf %124, %126 : vector<32x16xf32>
    %128 = arith.addf %123, %127 : vector<32x16xf32>
    %cst_47 = arith.constant 0.000000e+00 : f32
    %129 = vector.broadcast %cst_47 : f32 to vector<32x16xf32>
    %130 = arith.maximumf %128, %129 : vector<32x16xf32>
    %c128 = arith.constant 128 : index
    %c0_48 = arith.constant 0 : index
    %131 = vector.load %arg2[%c128, %c0_48] : memref<200x128xf32, #tpu.memory_space<vmem>>, vector<16x32xf32>
    %cst_49 = arith.constant dense<0.000000e+00> : vector<32x32xf32>
    %132 = tpu.matmul %130, %131, %cst_49 {dimension_numbers = #tpu.dot_dimension_numbers<[1], [0], [0], [1], [0, 0, 1, 1], [], []>} : vector<32x16xf32>, vector<16x32xf32>, vector<32x32xf32> -> vector<32x32xf32>
    %133 = vector.extract_strided_slice %132 {offsets = [0, 0], sizes = [32, 16], strides = [1, 1]} : vector<32x32xf32> to vector<32x16xf32>
    %c2_i32_50 = arith.constant 2 : i32
    %134 = tpu.dynamic_rotate %133 by %c2_i32_50 dim 0 : vector<32x16xf32>, i32 -> vector<32x16xf32>
    %cst_51 = arith.constant 0.000000e+00 : f32
    %135 = vector.shape_cast %22 : vector<32x1xi1> to vector<32x1xi1>
    %136 = vector.broadcast %135 : vector<32x1xi1> to vector<32x16xi1>
    %137 = vector.broadcast %cst_51 : f32 to vector<32x16xf32>
    %138 = arith.select %136, %137, %134 : vector<32x16xi1>, vector<32x16xf32>
    %139 = vector.extract_strided_slice %132 {offsets = [0, 16], sizes = [32, 16], strides = [1, 1]} : vector<32x32xf32> to vector<32x16xf32>
    %140 = arith.addf %138, %139 : vector<32x16xf32>
    %c144 = arith.constant 144 : index
    %c0_52 = arith.constant 0 : index
    %141 = vector.load %arg2[%c144, %c0_52] : memref<200x128xf32, #tpu.memory_space<vmem>>, vector<1x16xf32>
    %142 = vector.broadcast %141 : vector<1x16xf32> to vector<32x16xf32>
    %143 = arith.addf %140, %142 : vector<32x16xf32>
    %cst_53 = arith.constant 0.000000e+00 : f32
    %144 = vector.broadcast %cst_53 : f32 to vector<32x16xf32>
    %145 = arith.maximumf %143, %144 : vector<32x16xf32>
    %c152 = arith.constant 152 : index
    %c0_54 = arith.constant 0 : index
    %146 = vector.load %arg2[%c152, %c0_54] : memref<200x128xf32, #tpu.memory_space<vmem>>, vector<16x32xf32>
    %cst_55 = arith.constant dense<0.000000e+00> : vector<32x32xf32>
    %147 = tpu.matmul %145, %146, %cst_55 {dimension_numbers = #tpu.dot_dimension_numbers<[1], [0], [0], [1], [0, 0, 1, 1], [], []>} : vector<32x16xf32>, vector<16x32xf32>, vector<32x32xf32> -> vector<32x32xf32>
    %148 = vector.extract_strided_slice %147 {offsets = [0, 0], sizes = [32, 16], strides = [1, 1]} : vector<32x32xf32> to vector<32x16xf32>
    %c2_i32_56 = arith.constant 2 : i32
    %149 = tpu.dynamic_rotate %148 by %c2_i32_56 dim 0 : vector<32x16xf32>, i32 -> vector<32x16xf32>
    %cst_57 = arith.constant 0.000000e+00 : f32
    %150 = vector.shape_cast %22 : vector<32x1xi1> to vector<32x1xi1>
    %151 = vector.broadcast %150 : vector<32x1xi1> to vector<32x16xi1>
    %152 = vector.broadcast %cst_57 : f32 to vector<32x16xf32>
    %153 = arith.select %151, %152, %149 : vector<32x16xi1>, vector<32x16xf32>
    %154 = vector.extract_strided_slice %147 {offsets = [0, 16], sizes = [32, 16], strides = [1, 1]} : vector<32x32xf32> to vector<32x16xf32>
    %155 = arith.addf %153, %154 : vector<32x16xf32>
    %c168 = arith.constant 168 : index
    %c0_58 = arith.constant 0 : index
    %156 = vector.load %arg2[%c168, %c0_58] : memref<200x128xf32, #tpu.memory_space<vmem>>, vector<1x16xf32>
    %157 = vector.broadcast %156 : vector<1x16xf32> to vector<32x16xf32>
    %158 = arith.addf %155, %157 : vector<32x16xf32>
    %cst_59 = arith.constant 0.000000e+00 : f32
    %159 = vector.broadcast %cst_59 : f32 to vector<32x16xf32>
    %160 = arith.maximumf %158, %159 : vector<32x16xf32>
    %161 = arith.addf %160, %130 : vector<32x16xf32>
    %cst_60 = arith.constant 0.000000e+00 : f32
    %162 = vector.broadcast %cst_60 : f32 to vector<32x16xf32>
    %163 = arith.maximumf %161, %162 : vector<32x16xf32>
    %c176 = arith.constant 176 : index
    %c0_61 = arith.constant 0 : index
    %164 = vector.load %arg2[%c176, %c0_61] : memref<200x128xf32, #tpu.memory_space<vmem>>, vector<16x3xf32>
    %cst_62 = arith.constant dense<0.000000e+00> : vector<32x3xf32>
    %165 = tpu.matmul %163, %164, %cst_62 {dimension_numbers = #tpu.dot_dimension_numbers<[1], [0], [0], [1], [0, 0, 1, 1], [], []>} : vector<32x16xf32>, vector<16x3xf32>, vector<32x3xf32> -> vector<32x3xf32>
    %c192 = arith.constant 192 : index
    %c0_63 = arith.constant 0 : index
    %166 = vector.load %arg2[%c192, %c0_63] : memref<200x128xf32, #tpu.memory_space<vmem>>, vector<1x3xf32>
    %167 = vector.broadcast %166 : vector<1x3xf32> to vector<32x3xf32>
    %168 = arith.addf %165, %167 : vector<32x3xf32>
    %c0_64 = arith.constant 0 : index
    %c0_65 = arith.constant 0 : index
    %169 = vector.load %arg3[%c0_64, %c0_65] : memref<32x3xf32, #tpu.memory_space<vmem>>, vector<32x3xf32>
    tpu.vector_store %arg3[%c0_64, %c0_65], %168 {strides = array<i32>} : memref<32x3xf32, #tpu.memory_space<vmem>>, vector<32x3xf32>,
    return
  }
}

</mosaic_0001>

<bundles_post_ra>
// kernel: basic_task_net.1
= control target key start
LH: loop header
LB: loop body
LE: loop exit
PB: predicated region body
PF: predicated region fallthrough
CT: control target
= control target key end

     0   :  { %vm97_vm0 = vcmask 1044480   ;;  %vm84_vm1 = vcmask 39936   ;;  %s1674_s26 = smov 16   ;;  %v22_v11 = vlaneseq  ;;  %vm241_vm5 = vcmask 64512   ;;  %s1675_s4 = smov 112   ;;  %s2098_s2 = inlined_call_operand.vmem [shape: f32[200,128], index: 2, kind: input, shape index: {}]   ;;  %s2099_s0 = inlined_call_operand.vmem [shape: f32[32,5], index: 0, kind: input, shape index: {}]   ;;  %s2100_s1 = inlined_call_operand.vmem [shape: f32[32,4], index: 1, kind: input, shape index: {}]   ;;  %s2101_s3 = inlined_call_operand.vmem [shape: f32[32,3], index: 3, kind: output, shape index: {}]  }
   0x1   :  { %v83_v0 = vld [vmem:[%s2098_s2] sm:$0x1f]  ;;  %v16_v2 = vld [vmem:[%s2099_s0 + $0x10] sm:$0xff]  ;;  %v15_v3 = vld [vmem:[%s2099_s0 + $0x8] sm:$0xff]  ;;  %vm759_vm9 = vcmask 1043456   ;;  %s1676_s19 = smov 8  }
   0x2   :  { %v14_v1 = vld [vmem:[%s2099_s0] sm:$0xff]  ;;  %1583 = vmatprep.subr.msk.mxu0 %vm97_vm0, %v83_v0  ;;  %1665 = vmatprep.subr.msk.mxu1 %vm97_vm0, %v83_v0  ;;  %v17_v4 = vld [vmem:[%s2099_s0 + $0x18] sm:$0xff]  ;;  %v240_v5 = vld [vmem:[%s2098_s2 + $0x10] sm:$0xff]  ;;  %s1673_s0 = smov 120   ;;  %v1736_v12 = vshrl.u32 %v22_v11, 7  ;;  %vm746_vm10 = vcmask 97280  }
   0x3   :  { %1584 = vmatpush3.msk.msra.mxu0 %vm97_vm0, %v83_v0  ;;  %1666 = vmatpush3.msk.msra.mxu1 %vm97_vm0, %v83_v0  ;;  %v1495_v10 = vld [vmem:[%s2098_s2 + $0x20] ss:$0 sm:$0xff]  ;;  %v1489_v24 = vld [vmem:[%s2098_s2 + $0x8] ss:$0 sm:$0xff]  ;;  %v1494_v62 = vld [vmem:[%s2098_s2 + $0x18] ss:$0 sm:$0xff] }
   0x4   :  { %1585 = vmatprep.mubr.msk.f32.mxu0 %vm84_vm1, %v14_v1  ;;  %1588 = vmatprep.mubr.msk.f32.mxu1 %vm84_vm1, %v16_v2  ;;  %v1739_v13 = vadd.s32 16, %v1736_v12  ;;  %v31_v16 = vand.u32 15, %v1736_v12  ;;  %vm190_vm2 = vcmp.lt.s32.totalorder %v1736_v12, 1  ;;  %v421_v46 = vld [vmem:[%s2098_s2 + $0x28] sm:$0xff]  ;;  %vm523_vm6 = vcmp.lt.s32.totalorder %v1736_v12, 2  ;;  %s1677_s30 = smov 32  }
   0x5   :  { %1586 = vmatmul.mubr.msk.f32.vlgmr.msra.gmra.mxu0 %vm84_vm1, %v15_v3  ;;  %1589 = vmatmul.mubr.msk.f32.vlgmr.msra.gmra.mxu1 %vm84_vm1, %v17_v4  ;;  %vm895_vm11 = vcmask 130048   ;;  %s1678_s11 = smov 96   ;;  %vm1475_vm12 = vcmask 23552  }
   0x6   :  { %1591 = vmatprep.subr.mxu1 %v240_v5  ;;  %v45_v18 = vand.u32 15, %v1739_v13  ;;  %vm1750_vm3 = vcmp.lt.s32.totalorder %v31_v16, 1  ;;  %1599 = vmatprep.subr.mxu0 %v421_v46  ;;  %vm1847_vm7 = vcmp.lt.s32.totalorder %v31_v16, 2 }
   0x7   :  { %1592 = vmatpush3.msra.mxu1 %v240_v5  ;;  %1600 = vmatpush3.msra.mxu0 %v421_v46 }
   0x8   :  { %vm1758_vm4 = vcmp.lt.s32.totalorder %v45_v18, 1  ;;  %vm1858_vm8 = vcmp.lt.s32.totalorder %v45_v18, 2 }
  0xc5   :  { %v1717_v6 = vpop.f32.mrf.mxu0  ;;  %v1719_v7 = vpop.f32.mrf.mxu1 }
  0xc6   :  { %v189_v14 = vrot.slane %v1719_v7, 7  ;;  %v187_v19 = vrot.slane %v1717_v6, 7 }
  0xc7   :  { %v1721_v8 = vpop.f32.mrf.mxu0  ;;  %v1723_v9 = vpop.f32.mrf.mxu1 }
  0xc8   :  { %215 = vrot.lane.b32.xlu1 %v1723_v9, %s1673_s0  ;;  %211 = vrot.lane.b32.xlu0 %v1721_v8, %s1673_s0  ;;  %v186_v15 = vrot.slane %v1721_v8, 7  ;;  %v188_v17 = vrot.slane %v1723_v9, 7 }
  0xca   :  { %v194_v21 = vsel %vm190_vm2, %v189_v14, %v186_v15  ;;  %v192_v23 = vsel %vm190_vm2, %v187_v19, %v188_v17  ;;  %v191_v33 = vsel %vm190_vm2, %v188_v17, %v189_v14  ;;  %v193_v35 = vsel %vm190_vm2, %v186_v15, %v187_v19 }
  0xcb   :  { %v203_v27 = vsel %vm1750_vm3, 0.0, %v194_v21  ;;  %v205_v28 = vsel %vm1758_vm4, 0.0, %v192_v23 }
  0xcc   :  { %217 = vrot.lane.b32.xlu1 %v1719_v7, %s1673_s0  ;;  %213 = vrot.lane.b32.xlu0 %v1717_v6, %s1673_s0 }
  0xd0   :  { %390 = vrot.lane.b32.xlu0 %v1495_v10, %s1674_s26 }
 0x13a   :  { %v216_v25 = vpop.permute.xlu1 %215  ;;  %v212_v26 = vpop.permute.xlu0 %211 }
 0x13b   :  { %v223_v29 = vadd.f32 %v212_v26, %v203_v27  ;;  %v225_v30 = vadd.f32 %v216_v25, %v205_v28 }
 0x13d   :  { %v232_v31 = vadd.f32 %v1489_v24, %v223_v29  ;;  %v234_v39 = vadd.f32 %v1489_v24, %v225_v30 }
 0x13e   :  { %v218_v32 = vpop.permute.xlu1 %217  ;;  %v214_v34 = vpop.permute.xlu0 %213 }
 0x13f   :  { %v236_v36 = vmax.f32 %v232_v31, 0.0  ;;  %v226_v37 = vadd.f32 %v218_v32, %v191_v33  ;;  %v224_v38 = vadd.f32 %v214_v34, %v193_v35  ;;  %v238_v43 = vmax.f32 %v234_v39, 0.0 }
 0x141   :  { %v233_v40 = vadd.f32 %v1489_v24, %v224_v38  ;;  %1593 = vmatprep.mubr.msk.f32.mxu1 %vm241_vm5, %v236_v36  ;;  %v235_v41 = vadd.f32 %v1489_v24, %v226_v37  ;;  %v573_v36 = vld [vmem:[%s2098_s2 + $0x38] sm:$0xff] }
 0x142   :  { %v391_v50 = vpop.permute.xlu0 %390  ;;  %1607 = vmatprep.subr.mxu1 %v573_v36 }
 0x143   :  { %v237_v42 = vmax.f32 %v233_v40, 0.0  ;;  %v239_v44 = vmax.f32 %v235_v41, 0.0  ;;  %v394_v55 = vadd.f32 %v1717_v6, %v391_v50  ;;  %v393_v57 = vadd.f32 %v391_v50, %v1721_v8 }
 0x144   :  { %v396_v58 = vadd.f32 %v1719_v7, %v391_v50  ;;  %v395_v59 = vadd.f32 %v391_v50, %v1723_v9 }
 0x145   :  { %1594 = vmatmul.mubr.msk.f32.vlgmr.msra.gmra.mxu1 %vm241_vm5, %v237_v42 }
 0x146   :  { %1596 = vmatprep.mubr.msk.f32.mxu1 %vm241_vm5, %v238_v43  ;;  %1608 = vmatpush3.msra.mxu1 %v573_v36 }
 0x149   :  { %1597 = vmatmul.mubr.msk.f32.gmra.mxu1 %vm241_vm5, %v239_v44 }
 0x205   :  { %v1595_v45 = vpop.f32.mrf.mxu1 }
 0x206   :  { %357 = vrot.lane.b32.xlu0 %v1595_v45, %s1673_s0  ;;  %v340_v48 = vrot.slane %v1595_v45, 7 }
 0x207   :  { %v320_v47 = vpop.f32.mrf.mxu1 }
 0x208   :  { %v339_v49 = vrot.slane %v320_v47, 7  ;;  %355 = vrot.lane.b32.xlu1 %v320_v47, %s1673_s0 }
 0x209   :  { %v1598_v51 = vpop.f32.mrf.mxu1 }
 0x20a   :  { %v342_v52 = vrot.slane %v1598_v51, 7  ;;  %361 = vrot.lane.b32.xlu0 %v1598_v51, %s1673_s0  ;;  %v345_v53 = vsel %vm190_vm2, %v339_v49, %v340_v48 }
 0x20b   :  { %v330_v54 = vpop.f32.mrf.mxu1 }
 0x20c   :  { %359 = vrot.lane.b32.xlu1 %v330_v54, %s1673_s0  ;;  %v346_v56 = vsel %vm190_vm2, %v342_v52, %v339_v49  ;;  %v341_v60 = vrot.slane %v330_v54, 7  ;;  %v1500_v49 = vld [vmem:[%s2098_s2 + $0x30] ss:$0 sm:$0xff] }
 0x20d   :  { %v347_v1 = vsel %vm1750_vm3, 0.0, %v346_v56 }
 0x20e   :  { %403 = vrot.lane.b32.xlu0 %v394_v55, %s1675_s4  ;;  %v344_v3 = vsel %vm190_vm2, %v340_v48, %v341_v60  ;;  %v343_v6 = vsel %vm190_vm2, %v341_v60, %v342_v52 }
 0x20f   :  { %v349_v10 = vsel %vm1758_vm4, 0.0, %v344_v3  ;;  %v745_v3 = vld [vmem:[%s2098_s2 + $0x50] sm:$0xf] }
 0x210   :  { %401 = vrot.lane.b32.xlu1 %v393_v57, %s1675_s4  ;;  %1615 = vmatprep.subr.msk.mxu0 %vm759_vm9, %v745_v3 }
 0x212   :  { %407 = vrot.lane.b32.xlu0 %v396_v58, %s1675_s4 }
 0x214   :  { %405 = vrot.lane.b32.xlu1 %v395_v59, %s1675_s4 }
 0x278   :  { %v358_v61 = vpop.permute.xlu0 %357 }
 0x279   :  { %v368_v63 = vadd.f32 %v358_v61, %v345_v53 }
 0x27a   :  { %v356_v0 = vpop.permute.xlu1 %355 }
 0x27b   :  { %v367_v2 = vadd.f32 %v356_v0, %v347_v1  ;;  %v377_v4 = vadd.f32 %v1494_v62, %v368_v63 }
 0x27c   :  { %v362_v5 = vpop.permute.xlu0 %361 }
 0x27d   :  { %v376_v7 = vadd.f32 %v1494_v62, %v367_v2  ;;  %v370_v8 = vadd.f32 %v362_v5, %v343_v6  ;;  %v381_v15 = vmax.f32 %v377_v4, 0.0  ;;  %v744_v5 = vld [vmem:[%s2098_s2 + $0x48] sm:$0xff] }
 0x27e   :  { %v360_v9 = vpop.permute.xlu1 %359 }
 0x27f   :  { %v369_v11 = vadd.f32 %v360_v9, %v349_v10  ;;  %v379_v14 = vadd.f32 %v1494_v62, %v370_v8  ;;  %v380_v21 = vmax.f32 %v376_v7, 0.0 }
 0x280   :  { %v404_v17 = vpop.permute.xlu0 %403 }
 0x281   :  { %v378_v19 = vadd.f32 %v1494_v62, %v369_v11  ;;  %v1809_v23 = vadd.f32 %v404_v17, %v381_v15  ;;  %v383_v27 = vmax.f32 %v379_v14, 0.0  ;;  %v19_v15 = vld [vmem:[%s2100_s1 + $0x8] sm:$0xff] }
 0x282   :  { %v402_v24 = vpop.permute.xlu1 %401 }
 0x283   :  { %v1811_v25 = vadd.f32 %v402_v24, %v380_v21  ;;  %v382_v29 = vmax.f32 %v378_v19, 0.0  ;;  %v418_v30 = vmax.f32 %v1809_v23, 0.0  ;;  %v18_v19 = vld [vmem:[%s2100_s1] sm:$0xff]  ;;  %v21_v21 = vld [vmem:[%s2100_s1 + $0x18] sm:$0xff]  ;;  %v20_v24 = vld [vmem:[%s2100_s1 + $0x10] sm:$0xff] }
 0x284   :  { %v408_v26 = vpop.permute.xlu0 %407 }
 0x285   :  { %v417_v28 = vmax.f32 %v1811_v25, 0.0  ;;  %v1815_v31 = vadd.f32 %v408_v26, %v383_v27  ;;  %v1505_v27 = vld [vmem:[%s2098_s2 + $0x40] ss:$0 sm:$0xff] }
 0x286   :  { %v406_v32 = vpop.permute.xlu1 %405 }
 0x287   :  { %v1817_v33 = vadd.f32 %v406_v32, %v382_v29  ;;  %1601 = vmatprep.mubr.msk.f32.mxu0 %vm241_vm5, %v417_v28  ;;  %v420_v35 = vmax.f32 %v1815_v31, 0.0 }
 0x288   :  { %1602 = vmatmul.mubr.msk.f32.vlgmr.msra.gmra.mxu0 %vm241_vm5, %v418_v30 }
 0x289   :  { %v419_v34 = vmax.f32 %v1817_v33, 0.0  ;;  %1616 = vmatpush3.msk.msra.mxu0 %vm759_vm9, %v745_v3  ;;  %v894_v33 = vld [vmem:[%s2098_s2 + $0x68] sm:$0xff]  ;;  %v1517_v3 = vld [vmem:[%s2098_s2 + $0x78] ss:$0 sm:$0xff] }
 0x28a   :  { %1617 = vmatprep.subr.mxu0 %v744_v5  ;;  %1625 = vmatprep.subr.mxu1 %v894_v33 }
 0x28b   :  { %1604 = vmatprep.mubr.msk.f32.mxu0 %vm241_vm5, %v419_v34  ;;  %1618 = vmatpush3.msra.mxu0 %v744_v5 }
 0x28c   :  { %1605 = vmatmul.mubr.msk.f32.gmra.mxu0 %vm241_vm5, %v420_v35 }
 0x348   :  { %v1603_v37 = vpop.f32.mrf.mxu0 }
 0x349   :  { %546 = vrot.lane.b32.xlu0 %v1603_v37, %s1673_s0  ;;  %v520_v39 = vrot.slane %v1603_v37, 6 }
 0x34a   :  { %v500_v38 = vpop.f32.mrf.mxu0 }
 0x34b   :  { %v519_v40 = vrot.slane %v500_v38, 6  ;;  %544 = vrot.lane.b32.xlu1 %v500_v38, %s1673_s0 }
 0x34c   :  { %v1606_v41 = vpop.f32.mrf.mxu0 }
 0x34d   :  { %v522_v42 = vrot.slane %v1606_v41, 6  ;;  %550 = vrot.lane.b32.xlu0 %v1606_v41, %s1673_s0  ;;  %v526_v43 = vsel %vm523_vm6, %v519_v40, %v520_v39 }
 0x34e   :  { %v510_v44 = vpop.f32.mrf.mxu0 }
 0x34f   :  { %548 = vrot.lane.b32.xlu1 %v510_v44, %s1673_s0  ;;  %v527_v45 = vsel %vm523_vm6, %v522_v42, %v519_v40  ;;  %v521_v46 = vrot.slane %v510_v44, 6 }
 0x350   :  { %v536_v52 = vsel %vm1847_vm7, 0.0, %v527_v45 }
 0x351   :  { %v525_v16 = vsel %vm523_vm6, %v520_v39, %v521_v46  ;;  %v524_v57 = vsel %vm523_vm6, %v521_v46, %v522_v42 }
 0x352   :  { %v538_v61 = vsel %vm1858_vm8, 0.0, %v525_v16 }
 0x3bb   :  { %v547_v48 = vpop.permute.xlu0 %546 }
 0x3bc   :  { %v557_v50 = vadd.f32 %v547_v48, %v526_v43 }
 0x3bd   :  { %v545_v51 = vpop.permute.xlu1 %544 }
 0x3be   :  { %v556_v53 = vadd.f32 %v545_v51, %v536_v52  ;;  %v566_v55 = vadd.f32 %v1500_v49, %v557_v50 }
 0x3bf   :  { %v551_v56 = vpop.permute.xlu0 %550 }
 0x3c0   :  { %v565_v58 = vadd.f32 %v1500_v49, %v556_v53  ;;  %v559_v59 = vadd.f32 %v551_v56, %v524_v57  ;;  %v570_v18 = vmax.f32 %v566_v55, 0.0 }
 0x3c1   :  { %v549_v60 = vpop.permute.xlu1 %548 }
 0x3c2   :  { %v569_v62 = vmax.f32 %v565_v58, 0.0  ;;  %v558_v13 = vadd.f32 %v549_v60, %v538_v61  ;;  %v568_v63 = vadd.f32 %v1500_v49, %v559_v59 }
 0x3c4   :  { %v567_v0 = vadd.f32 %v1500_v49, %v558_v13  ;;  %1609 = vmatprep.mubr.msk.f32.mxu1 %vm241_vm5, %v569_v62  ;;  %v572_v2 = vmax.f32 %v568_v63, 0.0 }
 0x3c5   :  { %1610 = vmatmul.mubr.msk.f32.vlgmr.msra.gmra.mxu1 %vm241_vm5, %v570_v18 }
 0x3c6   :  { %v571_v1 = vmax.f32 %v567_v0, 0.0  ;;  %1626 = vmatpush3.msra.mxu1 %v894_v33 }
 0x3c8   :  { %1612 = vmatprep.mubr.msk.f32.mxu1 %vm241_vm5, %v571_v1 }
 0x3c9   :  { %1613 = vmatmul.mubr.msk.f32.gmra.mxu1 %vm241_vm5, %v572_v2 }
 0x485   :  { %v1611_v4 = vpop.f32.mrf.mxu1 }
 0x486   :  { %689 = vrot.lane.b32.xlu0 %v1611_v4, %s1673_s0  ;;  %v672_v7 = vrot.slane %v1611_v4, 6 }
 0x487   :  { %v652_v6 = vpop.f32.mrf.mxu1 }
 0x488   :  { %v671_v8 = vrot.slane %v652_v6, 6  ;;  %687 = vrot.lane.b32.xlu1 %v652_v6, %s1673_s0 }
 0x489   :  { %v1614_v9 = vpop.f32.mrf.mxu1 }
 0x48a   :  { %v674_v10 = vrot.slane %v1614_v9, 6  ;;  %693 = vrot.lane.b32.xlu0 %v1614_v9, %s1673_s0  ;;  %v677_v11 = vsel %vm523_vm6, %v671_v8, %v672_v7 }
 0x48b   :  { %v662_v14 = vpop.f32.mrf.mxu1 }
 0x48c   :  { %691 = vrot.lane.b32.xlu1 %v662_v14, %s1673_s0  ;;  %v678_v17 = vsel %vm523_vm6, %v674_v10, %v671_v8  ;;  %v673_v26 = vrot.slane %v662_v14, 6 }
 0x48d   :  { %v679_v37 = vsel %vm1847_vm7, 0.0, %v678_v17 }
 0x48e   :  { %730 = vrot.lane.b32.xlu0 %v19_v15, %s1676_s19  ;;  %v676_v40 = vsel %vm523_vm6, %v672_v7, %v673_v26  ;;  %v675_v42 = vsel %vm523_vm6, %v673_v26, %v674_v10 }
 0x48f   :  { %v681_v48 = vsel %vm1858_vm8, 0.0, %v676_v40 }
 0x490   :  { %728 = vrot.lane.b32.xlu1 %v18_v19, %s1676_s19 }
 0x492   :  { %734 = vrot.lane.b32.xlu0 %v21_v21, %s1676_s19 }
 0x494   :  { %732 = vrot.lane.b32.xlu1 %v20_v24, %s1676_s19 }
 0x4f8   :  { %v690_v29 = vpop.permute.xlu0 %689 }
 0x4f9   :  { %v700_v32 = vadd.f32 %v690_v29, %v677_v11  ;;  %v1511_v11 = vld [vmem:[%s2098_s2 + $0x58] ss:$0 sm:$0xff] }
 0x4fa   :  { %v688_v36 = vpop.permute.xlu1 %687 }
 0x4fb   :  { %v709_v38 = vadd.f32 %v1505_v27, %v700_v32  ;;  %v699_v39 = vadd.f32 %v688_v36, %v679_v37 }
 0x4fc   :  { %v694_v41 = vpop.permute.xlu0 %693 }
 0x4fd   :  { %v713_v43 = vmax.f32 %v709_v38, 0.0  ;;  %v708_v44 = vadd.f32 %v1505_v27, %v699_v39  ;;  %v702_v45 = vadd.f32 %v694_v41, %v675_v42 }
 0x4fe   :  { %v692_v46 = vpop.permute.xlu1 %691 }
 0x4ff   :  { %v717_v49 = vadd.f32 %v713_v43, %v418_v30  ;;  %v712_v50 = vmax.f32 %v708_v44, 0.0  ;;  %v711_v51 = vadd.f32 %v1505_v27, %v702_v45  ;;  %v701_v52 = vadd.f32 %v692_v46, %v681_v48  ;;  %v1076_v45 = vld [vmem:[%s2098_s2 + $0x88] sm:$0xff]  ;;  %v1075_v48 = vld [vmem:[%s2098_s2 + $0x80] sm:$0xff] }
 0x500   :  { %v731_v56 = vpop.permute.xlu0 %730  ;;  %1635 = vmatprep.subr.mxu0 %v1076_v45 }
 0x501   :  { %v716_v53 = vadd.f32 %v712_v50, %v417_v28  ;;  %v715_v16 = vmax.f32 %v711_v51, 0.0  ;;  %v710_v55 = vadd.f32 %v1505_v27, %v701_v52  ;;  %v721_v57 = vmax.f32 %v717_v49, 0.0 }
 0x502   :  { %v729_v58 = vpop.permute.xlu1 %728 }
 0x503   :  { %v720_v59 = vmax.f32 %v716_v53, 0.0  ;;  %v719_v60 = vadd.f32 %v715_v16, %v420_v35  ;;  %v714_v61 = vmax.f32 %v710_v55, 0.0  ;;  %v741_v25 = vsel %vm241_vm5, %v721_v57, %v731_v56 }
 0x504   :  { %v735_v18 = vpop.permute.xlu0 %734 }
 0x505   :  { %v718_v23 = vadd.f32 %v714_v61, %v419_v34  ;;  %v740_v30 = vsel %vm241_vm5, %v720_v59, %v729_v58  ;;  %v723_v62 = vmax.f32 %v719_v60, 0.0  ;;  %v893_v34 = vld [vmem:[%s2098_s2 + $0x60] sm:$0xff] }
 0x506   :  { %1619 = vmatprep.mubr.msk.f32.mxu0 %vm746_vm10, %v740_v30  ;;  %v733_v28 = vpop.permute.xlu1 %732  ;;  %1627 = vmatprep.subr.mxu1 %v893_v34 }
 0x507   :  { %v722_v13 = vmax.f32 %v718_v23, 0.0  ;;  %1620 = vmatmul.mubr.msk.f32.vlgmr.msra.gmra.mxu0 %vm746_vm10, %v741_v25  ;;  %v743_v31 = vsel %vm241_vm5, %v723_v62, %v735_v18  ;;  %1628 = vmatpush3.msra.mxu1 %v893_v34  ;;  %v1516_v62 = vld [vmem:[%s2098_s2 + $0x70] ss:$0 sm:$0xff] }
 0x508   :  { %1636 = vmatpush3.msra.mxu0 %v1076_v45 }
 0x509   :  { %v742_v63 = vsel %vm241_vm5, %v722_v13, %v733_v28  ;;  %1637 = vmatprep.subr.mxu0 %v1075_v48 }
 0x50a   :  { %1622 = vmatprep.mubr.msk.f32.mxu0 %vm746_vm10, %v742_v63  ;;  %1638 = vmatpush3.msra.mxu0 %v1075_v48  ;;  %v1522_v48 = vld [vmem:[%s2098_s2 + $0x90] ss:$0 sm:$0xff] }
 0x50b   :  { %1623 = vmatmul.mubr.msk.f32.gmra.mxu0 %vm746_vm10, %v743_v31 }
 0x5c7   :  { %v1621_v35 = vpop.f32.mrf.mxu0 }
 0x5c8   :  { %866 = vrot.lane.b32.xlu0 %v1621_v35, %s1675_s4  ;;  %v849_v6 = vrot.slane %v1621_v35, 7 }
 0x5c9   :  { %v1928_v0 = vpop.f32.mrf.mxu0 }
 0x5ca   :  { %864 = vrot.lane.b32.xlu1 %v1928_v0, %s1675_s4  ;;  %v848_v5 = vrot.slane %v1928_v0, 7 }
 0x5cb   :  { %v1932_v1 = vpop.f32.mrf.mxu0 }
 0x5cc   :  { %870 = vrot.lane.b32.xlu0 %v1932_v1, %s1675_s4  ;;  %v851_v4 = vrot.slane %v1932_v1, 7  ;;  %v854_v10 = vsel %vm190_vm2, %v848_v5, %v849_v6 }
 0x5cd   :  { %v1936_v2 = vpop.f32.mrf.mxu0 }
 0x5ce   :  { %868 = vrot.lane.b32.xlu1 %v1936_v2, %s1675_s4  ;;  %v850_v7 = vrot.slane %v1936_v2, 7  ;;  %v855_v8 = vsel %vm190_vm2, %v851_v4, %v848_v5 }
 0x5cf   :  { %v856_v17 = vsel %vm1750_vm3, 0.0, %v855_v8 }
 0x5d0   :  { %v853_v21 = vsel %vm190_vm2, %v849_v6, %v850_v7  ;;  %v852_v27 = vsel %vm190_vm2, %v850_v7, %v851_v4 }
 0x5d1   :  { %v858_v37 = vsel %vm1758_vm4, 0.0, %v853_v21 }
 0x5d2   :  { %1044 = vrot.lane.b32.xlu1 %v1517_v3, %s1677_s30 }
 0x63a   :  { %v867_v9 = vpop.permute.xlu0 %866 }
 0x63b   :  { %v877_v14 = vadd.f32 %v867_v9, %v854_v10 }
 0x63c   :  { %v865_v15 = vpop.permute.xlu1 %864 }
 0x63d   :  { %v876_v19 = vadd.f32 %v865_v15, %v856_v17  ;;  %v886_v24 = vadd.f32 %v1511_v11, %v877_v14 }
 0x63e   :  { %v871_v26 = vpop.permute.xlu0 %870 }
 0x63f   :  { %v885_v29 = vadd.f32 %v1511_v11, %v876_v19  ;;  %v879_v32 = vadd.f32 %v871_v26, %v852_v27  ;;  %v890_v40 = vmax.f32 %v886_v24, 0.0 }
 0x640   :  { %v869_v36 = vpop.permute.xlu1 %868 }
 0x641   :  { %v889_v38 = vmax.f32 %v885_v29, 0.0  ;;  %v878_v39 = vadd.f32 %v869_v36, %v858_v37  ;;  %v888_v41 = vadd.f32 %v1511_v11, %v879_v32  ;;  %v1220_v29 = vld [vmem:[%s2098_s2 + $0xa0] sm:$0xff]  ;;  %v1219_v32 = vld [vmem:[%s2098_s2 + $0x98] sm:$0xff] }
 0x642   :  { %1645 = vmatprep.subr.mxu1 %v1220_v29 }
 0x643   :  { %v887_v42 = vadd.f32 %v1511_v11, %v878_v39  ;;  %1629 = vmatprep.mubr.msk.f32.mxu1 %vm895_vm11, %v889_v38  ;;  %v892_v44 = vmax.f32 %v888_v41, 0.0 }
 0x644   :  { %1630 = vmatmul.mubr.msk.f32.vlgmr.msra.gmra.mxu1 %vm895_vm11, %v890_v40  ;;  %v1045_v52 = vpop.permute.xlu1 %1044 }
 0x645   :  { %v891_v43 = vmax.f32 %v887_v42, 0.0  ;;  %v1048_v57 = vadd.f32 %v1621_v35, %v1045_v52  ;;  %v1047_v59 = vadd.f32 %v1045_v52, %v1928_v0  ;;  %v1050_v60 = vadd.f32 %v1932_v1, %v1045_v52  ;;  %1646 = vmatpush3.msra.mxu1 %v1220_v29 }
 0x646   :  { %v1049_v61 = vadd.f32 %v1045_v52, %v1936_v2  ;;  %1647 = vmatprep.subr.mxu1 %v1219_v32 }
 0x647   :  { %1632 = vmatprep.mubr.msk.f32.mxu1 %vm895_vm11, %v891_v43  ;;  %1648 = vmatpush3.msra.mxu1 %v1219_v32 }
 0x648   :  { %1633 = vmatmul.mubr.msk.f32.gmra.mxu1 %vm895_vm11, %v892_v44 }
 0x704   :  { %v1631_v46 = vpop.f32.mrf.mxu1 }
 0x705   :  { %1011 = vrot.lane.b32.xlu1 %v1631_v46, %s1675_s4  ;;  %v994_v50 = vrot.slane %v1631_v46, 7 }
 0x706   :  { %v974_v49 = vpop.f32.mrf.mxu1 }
 0x707   :  { %v993_v51 = vrot.slane %v974_v49, 7  ;;  %1009 = vrot.lane.b32.xlu0 %v974_v49, %s1675_s4 }
 0x708   :  { %v1634_v53 = vpop.f32.mrf.mxu1 }
 0x709   :  { %v996_v16 = vrot.slane %v1634_v53, 7  ;;  %1015 = vrot.lane.b32.xlu1 %v1634_v53, %s1675_s4  ;;  %v999_v55 = vsel %vm190_vm2, %v993_v51, %v994_v50 }
 0x70a   :  { %v984_v56 = vpop.f32.mrf.mxu1 }
 0x70b   :  { %1013 = vrot.lane.b32.xlu0 %v984_v56, %s1675_s4  ;;  %v1000_v58 = vsel %vm190_vm2, %v996_v16, %v993_v51  ;;  %v995_v23 = vrot.slane %v984_v56, 7 }
 0x70c   :  { %v1001_v13 = vsel %vm1750_vm3, 0.0, %v1000_v58 }
 0x70d   :  { %1057 = vrot.lane.b32.xlu1 %v1048_v57, %s1678_s11  ;;  %v998_v63 = vsel %vm190_vm2, %v994_v50, %v995_v23  ;;  %v997_v34 = vsel %vm190_vm2, %v995_v23, %v996_v16 }
 0x70e   :  { %v1003_v2 = vsel %vm1758_vm4, 0.0, %v998_v63  ;;  %v1371_v63 = vld [vmem:[%s2098_s2 + $0xb0] sm:$0xff] }
 0x70f   :  { %1055 = vrot.lane.b32.xlu0 %v1047_v59, %s1678_s11 }
 0x711   :  { %1061 = vrot.lane.b32.xlu1 %v1050_v60, %s1678_s11 }
 0x713   :  { %1059 = vrot.lane.b32.xlu0 %v1049_v61, %s1678_s11 }
 0x777   :  { %v1012_v30 = vpop.permute.xlu1 %1011 }
 0x778   :  { %v1022_v25 = vadd.f32 %v1012_v30, %v999_v55 }
 0x779   :  { %v1010_v28 = vpop.permute.xlu0 %1009 }
 0x77a   :  { %v1021_v18 = vadd.f32 %v1010_v28, %v1001_v13  ;;  %v1031_v31 = vadd.f32 %v1516_v62, %v1022_v25 }
 0x77b   :  { %v1016_v33 = vpop.permute.xlu1 %1015 }
 0x77c   :  { %v1030_v35 = vadd.f32 %v1516_v62, %v1021_v18  ;;  %v1024_v0 = vadd.f32 %v1016_v33, %v997_v34  ;;  %v1035_v5 = vmax.f32 %v1031_v31, 0.0  ;;  %v1372_v18 = vld [vmem:[%s2098_s2 + $0xb8] sm:$0xff] }
 0x77d   :  { %v1014_v1 = vpop.permute.xlu0 %1013  ;;  %1655 = vmatprep.subr.mxu0 %v1372_v18 }
 0x77e   :  { %v1023_v3 = vadd.f32 %v1014_v1, %v1003_v2  ;;  %v1033_v4 = vadd.f32 %v1516_v62, %v1024_v0  ;;  %v1034_v7 = vmax.f32 %v1030_v35, 0.0 }
 0x77f   :  { %v1058_v20 = vpop.permute.xlu1 %1057 }
 0x780   :  { %v1032_v6 = vadd.f32 %v1516_v62, %v1023_v3  ;;  %v1993_v8 = vadd.f32 %v1058_v20, %v1035_v5  ;;  %v1037_v14 = vmax.f32 %v1033_v4, 0.0 }
 0x781   :  { %v1056_v9 = vpop.permute.xlu0 %1055 }
 0x782   :  { %v1995_v10 = vadd.f32 %v1056_v9, %v1034_v7  ;;  %v1036_v17 = vmax.f32 %v1032_v6, 0.0  ;;  %v1072_v19 = vmax.f32 %v1993_v8, 0.0  ;;  %v1527_v7 = vld [vmem:[%s2098_s2 + $0xa8] ss:$0 sm:$0xff] }
 0x783   :  { %v1062_v11 = vpop.permute.xlu1 %1061 }
 0x784   :  { %v1071_v15 = vmax.f32 %v1995_v10, 0.0  ;;  %v1999_v22 = vadd.f32 %v1062_v11, %v1037_v14  ;;  %v1528_v10 = vld [vmem:[%s2098_s2 + $0xc0] ss:$0 sm:$0xff] }
 0x785   :  { %v1060_v21 = vpop.permute.xlu0 %1059 }
 0x786   :  { %v2001_v24 = vadd.f32 %v1060_v21, %v1036_v17  ;;  %1639 = vmatprep.mubr.msk.f32.mxu0 %vm895_vm11, %v1071_v15  ;;  %v1074_v27 = vmax.f32 %v1999_v22, 0.0 }
 0x787   :  { %1640 = vmatmul.mubr.msk.f32.vlgmr.msra.gmra.mxu0 %vm895_vm11, %v1072_v19 }
 0x788   :  { %v1073_v26 = vmax.f32 %v2001_v24, 0.0  ;;  %1656 = vmatpush3.msra.mxu0 %v1372_v18 }
 0x789   :  { %1657 = vmatprep.subr.mxu0 %v1371_v63 }
 0x78a   :  { %1642 = vmatprep.mubr.msk.f32.mxu0 %vm895_vm11, %v1073_v26  ;;  %1658 = vmatpush3.msra.mxu0 %v1371_v63 }
 0x78b   :  { %1643 = vmatmul.mubr.msk.f32.gmra.mxu0 %vm895_vm11, %v1074_v27 }
 0x847   :  { %v1641_v36 = vpop.f32.mrf.mxu0 }
 0x848   :  { %1192 = vrot.lane.b32.xlu1 %v1641_v36, %s1675_s4  ;;  %v1175_v38 = vrot.slane %v1641_v36, 6 }
 0x849   :  { %v1155_v37 = vpop.f32.mrf.mxu0 }
 0x84a   :  { %v1174_v39 = vrot.slane %v1155_v37, 6  ;;  %1190 = vrot.lane.b32.xlu0 %v1155_v37, %s1675_s4 }
 0x84b   :  { %v1644_v40 = vpop.f32.mrf.mxu0 }
 0x84c   :  { %v1177_v41 = vrot.slane %v1644_v40, 6  ;;  %1196 = vrot.lane.b32.xlu1 %v1644_v40, %s1675_s4  ;;  %v1180_v42 = vsel %vm523_vm6, %v1174_v39, %v1175_v38 }
 0x84d   :  { %v1165_v43 = vpop.f32.mrf.mxu0 }
 0x84e   :  { %1194 = vrot.lane.b32.xlu0 %v1165_v43, %s1675_s4  ;;  %v1181_v44 = vsel %vm523_vm6, %v1177_v41, %v1174_v39  ;;  %v1176_v45 = vrot.slane %v1165_v43, 6 }
 0x84f   :  { %v1182_v51 = vsel %vm1847_vm7, 0.0, %v1181_v44 }
 0x850   :  { %v1179_v53 = vsel %vm523_vm6, %v1175_v38, %v1176_v45  ;;  %v1178_v56 = vsel %vm523_vm6, %v1176_v45, %v1177_v41 }
 0x851   :  { %v1184_v60 = vsel %vm1858_vm8, 0.0, %v1179_v53 }
 0x8ba   :  { %v1193_v46 = vpop.permute.xlu1 %1192 }
 0x8bb   :  { %v1203_v49 = vadd.f32 %v1193_v46, %v1180_v42 }
 0x8bc   :  { %v1191_v50 = vpop.permute.xlu0 %1190 }
 0x8bd   :  { %v1202_v52 = vadd.f32 %v1191_v50, %v1182_v51  ;;  %v1212_v16 = vadd.f32 %v1522_v48, %v1203_v49 }
 0x8be   :  { %v1197_v55 = vpop.permute.xlu1 %1196 }
 0x8bf   :  { %v1211_v57 = vadd.f32 %v1522_v48, %v1202_v52  ;;  %v1205_v58 = vadd.f32 %v1197_v55, %v1178_v56  ;;  %v1216_v30 = vmax.f32 %v1212_v16, 0.0 }
 0x8c0   :  { %v1195_v59 = vpop.permute.xlu0 %1194 }
 0x8c1   :  { %v1215_v61 = vmax.f32 %v1211_v57, 0.0  ;;  %v1204_v23 = vadd.f32 %v1195_v59, %v1184_v60  ;;  %v1214_v62 = vadd.f32 %v1522_v48, %v1205_v58 }
 0x8c3   :  { %v1213_v25 = vadd.f32 %v1522_v48, %v1204_v23  ;;  %1649 = vmatprep.mubr.msk.f32.mxu1 %vm895_vm11, %v1215_v61  ;;  %v1218_v13 = vmax.f32 %v1214_v62, 0.0 }
 0x8c4   :  { %1650 = vmatmul.mubr.msk.f32.vlgmr.msra.gmra.mxu1 %vm895_vm11, %v1216_v30 }
 0x8c5   :  { %v1217_v28 = vmax.f32 %v1213_v25, 0.0 }
 0x8c7   :  { %1652 = vmatprep.mubr.msk.f32.mxu1 %vm895_vm11, %v1217_v28 }
 0x8c8   :  { %1653 = vmatmul.mubr.msk.f32.gmra.mxu1 %vm895_vm11, %v1218_v13 }
 0x984   :  { %v1651_v31 = vpop.f32.mrf.mxu1 }
 0x985   :  { %1336 = vrot.lane.b32.xlu1 %v1651_v31, %s1675_s4  ;;  %v1319_v34 = vrot.slane %v1651_v31, 6 }
 0x986   :  { %v1299_v33 = vpop.f32.mrf.mxu1 }
 0x987   :  { %v1318_v35 = vrot.slane %v1299_v33, 6  ;;  %1334 = vrot.lane.b32.xlu0 %v1299_v33, %s1675_s4 }
 0x988   :  { %v1654_v0 = vpop.f32.mrf.mxu1 }
 0x989   :  { %v1321_v1 = vrot.slane %v1654_v0, 6  ;;  %1340 = vrot.lane.b32.xlu1 %v1654_v0, %s1675_s4  ;;  %v1324_v2 = vsel %vm523_vm6, %v1318_v35, %v1319_v34 }
 0x98a   :  { %v1309_v3 = vpop.f32.mrf.mxu1 }
 0x98b   :  { %v1320_v4 = vrot.slane %v1309_v3, 6  ;;  %1338 = vrot.lane.b32.xlu0 %v1309_v3, %s1675_s4  ;;  %v1325_v5 = vsel %vm523_vm6, %v1321_v1, %v1318_v35 }
 0x98c   :  { %v1326_v17 = vsel %vm1847_vm7, 0.0, %v1325_v5 }
 0x98d   :  { %v1322_v20 = vsel %vm523_vm6, %v1320_v4, %v1321_v1  ;;  %v1323_v6 = vsel %vm523_vm6, %v1319_v34, %v1320_v4 }
 0x98e   :  { %v1328_v12 = vsel %vm1858_vm8, 0.0, %v1323_v6 }
 0x9f7   :  { %v1337_v9 = vpop.permute.xlu1 %1336 }
 0x9f8   :  { %v1347_v11 = vadd.f32 %v1337_v9, %v1324_v2 }
 0x9f9   :  { %v1335_v14 = vpop.permute.xlu0 %1334 }
 0x9fa   :  { %v1356_v21 = vadd.f32 %v1527_v7, %v1347_v11  ;;  %v1346_v29 = vadd.f32 %v1335_v14, %v1326_v17 }
 0x9fb   :  { %v1341_v32 = vpop.permute.xlu1 %1340 }
 0x9fc   :  { %v1360_v36 = vmax.f32 %v1356_v21, 0.0  ;;  %v1355_v37 = vadd.f32 %v1527_v7, %v1346_v29  ;;  %v1349_v38 = vadd.f32 %v1341_v32, %v1322_v20 }
 0x9fd   :  { %v1339_v39 = vpop.permute.xlu0 %1338 }
 0x9fe   :  { %v1359_v40 = vmax.f32 %v1355_v37, 0.0  ;;  %v1358_v41 = vadd.f32 %v1527_v7, %v1349_v38  ;;  %v1348_v42 = vadd.f32 %v1339_v39, %v1328_v12  ;;  %v1364_v43 = vadd.f32 %v1360_v36, %v1072_v19 }
 0xa00   :  { %v1363_v47 = vadd.f32 %v1359_v40, %v1071_v15  ;;  %v1362_v44 = vmax.f32 %v1358_v41, 0.0  ;;  %v1357_v45 = vadd.f32 %v1527_v7, %v1348_v42  ;;  %v1368_v49 = vmax.f32 %v1364_v43, 0.0 }
 0xa02   :  { %v1367_v46 = vmax.f32 %v1363_v47, 0.0  ;;  %v1361_v48 = vmax.f32 %v1357_v45, 0.0  ;;  %v1366_v50 = vadd.f32 %v1362_v44, %v1074_v27 }
 0xa04   :  { %v1365_v54 = vadd.f32 %v1361_v48, %v1073_v26  ;;  %1659 = vmatprep.mubr.msk.f32.mxu0 %vm895_vm11, %v1367_v46  ;;  %v1370_v19 = vmax.f32 %v1366_v50, 0.0 }
 0xa05   :  { %1660 = vmatmul.mubr.msk.f32.vlgmr.msra.gmra.mxu0 %vm895_vm11, %v1368_v49 }
 0xa06   :  { %v1369_v8 = vmax.f32 %v1365_v54, 0.0 }
 0xa08   :  { %1662 = vmatprep.mubr.msk.f32.mxu0 %vm895_vm11, %v1369_v8 }
 0xa09   :  { %1663 = vmatmul.mubr.msk.f32.gmra.mxu0 %vm895_vm11, %v1370_v19 }
 0xac5   :  { %v1661_v15 = vpop.f32.mrf.mxu0 }
 0xac6   :  { %v1462_v22 = vadd.f32 %v1661_v15, %v1528_v10 }
 0xac7   :  { %v1456_v27 = vpop.f32.mrf.mxu0 }
 0xac8   :  { %1477 = vst.msk [vmem:[%s2101_s3 + $0x8] sm:$0xff] %vm1475_vm12, %v1462_v22  ;;  %v1457_v24 = vadd.f32 %v1528_v10, %v1456_v27 }
 0xac9   :  { %v1664_v26 = vpop.f32.mrf.mxu0 }
 0xaca   :  { %1476 = vst.msk [vmem:[%s2101_s3] sm:$0xff] %vm1475_vm12, %v1457_v24  ;;  %v1472_v51 = vadd.f32 %v1664_v26, %v1528_v10 }
 0xacb   :  { %v1466_v52 = vpop.f32.mrf.mxu0 }
 0xacc   :  { %1479 = vst.msk [vmem:[%s2101_s3 + $0x18] sm:$0xff] %vm1475_vm12, %v1472_v51  ;;  %v1467_v53 = vadd.f32 %v1528_v10, %v1466_v52 }
 0xace   :  { %1478 = vst.msk [vmem:[%s2101_s3 + $0x10] sm:$0xff] %vm1475_vm12, %v1467_v53 }

</bundles_post_ra>
